<compile_context>
chip_gen: v7x
topology: tpu7x:2x2x1
jax: 0.10.0
libtpu: 0.0.40
codegen_flags: <defaults>
</compile_context>

<pallas_src>
import jax
import jax.numpy as jnp
from jax.experimental import pallas as pl
from jax.experimental.pallas import tpu as pltpu


def _round_up(x, d):
    return ((x + d - 1) // d) * d


def _rbf_kernel_body(scal_ref, sq1_ref, sq2_ref, x1_ref, x2t_ref, o_ref, acc_ref):
    # scal_ref: (1,)  f32 SMEM  -> 2*gamma
    # sq1_ref : (bn,1) f32      -> -gamma * ||x1 row||^2
    # sq2_ref : (1,bm) f32      -> -gamma * ||x2 row||^2
    # x1_ref  : (bn,bk)          x1 tile (MXU LHS)
    # x2t_ref : (bk,bm)          x2^T tile (MXU RHS, already (K, N) layout)
    # o_ref   : (bn,bm)
    # acc_ref : (bn,bm) f32      cross-term accumulator (scratch)
    k = pl.program_id(2)

    @pl.when(k == 0)
    def _():
        acc_ref[...] = jnp.zeros_like(acc_ref)

    # Cross term on the MXU; RHS is pre-transposed so no in-kernel relayout.
    acc_ref[...] += jax.lax.dot_general(
        x1_ref[...], x2t_ref[...],
        dimension_numbers=(((1,), (0,)), ((), ())),
        preferred_element_type=jnp.float32,
    )

    @pl.when(k == pl.num_programs(2) - 1)
    def _():
        two_gamma = scal_ref[0]
        # t = -gamma * ||x1 - x2||^2 with gamma pre-folded into the norms.
        t = sq1_ref[...] + sq2_ref[...] + two_gamma * acc_ref[...]
        t = jnp.minimum(t, 0.0)  # == -gamma * max(dist, 0); guards cancellation
        if o_ref.dtype == jnp.bfloat16:
            # bf16 EUP exp path (v6e/v7x) and halved writeback bytes.
            t = t.astype(jnp.bfloat16)
        o_ref[...] = jnp.exp(t).astype(o_ref.dtype)


def _tile_cost_bytes(bn, bm, bk, in_bytes, out_bytes):
    return (2 * bk * (bn + bm) * in_bytes     # double-buffered x1 / x2^T tiles
            + 2 * (bn + bm) * 4               # double-buffered norm tiles
            + 2 * bn * bm * out_bytes         # double-buffered output tile
            + bn * bm * 4)                    # f32 accumulator scratch


def _choose_tiles(n, m, f, in_bytes, out_bytes, budget):
    bn = min(512, _round_up(n, 8))
    bm = min(512, _round_up(m, 128))

    # Feature (K) tile: keep the whole feature axis if it fits; otherwise split
    # into 128-multiples (requires zero-padding F up to a multiple of bk).
    if f <= 128 or _tile_cost_bytes(bn, bm, f, in_bytes, out_bytes) <= budget:
        bk = f
    else:
        max_bk = (budget - 2 * bn * bm * out_bytes - bn * bm * 4
                  - 2 * (bn + bm) * 4) // (2 * (bn + bm) * in_bytes)
        bk = max(128, (max_bk // 128) * 128)
        bk = min(bk, _round_up(f, 128))

    # Grow the row tile to cut x2 refetch traffic (each outer N step re-DMAs
    # all of x2) while the VMEM budget allows -- main lever on v5e/v6e.
    while (bn < 2048 and bn < _round_up(n, 8)
           and _tile_cost_bytes(min(2 * bn, _round_up(n, 8)), bm, bk,
                                in_bytes, out_bytes) <= budget):
        bn = min(2 * bn, _round_up(n, 8))
    return bn, bm, bk


def rbf_kernel_matrix(x1, x2, gamma, *, out_dtype=jnp.float32, mxu_dtype=None):
    """Pallas TPU implementation of Kernel.kernel_matrix with an RBF kernel.

    mxu_dtype: optional dtype (e.g. jnp.bfloat16) for the MXU cross-term
    operands; accumulation stays f32. Large-F workloads gain ~3-6x MXU
    throughput and half the x1/x2 DMA bytes at slightly reduced precision.
    """
    assert x1.ndim == 2 and x2.ndim == 2
    n, f = x1.shape
    m, f_ = x2.shape
    assert f == f_, "Feature size mismatch"

    # Generation-aware VMEM budget: leave headroom for Mosaic internal scratch
    # (v7x has only 64 MiB / TensorCore; v5e / v6e have 128 MiB).
    vmem_cap = 64 << 20
    try:
        vmem_cap = int(getattr(pltpu.get_tpu_info(),
                               "vmem_capacity_bytes", vmem_cap))
    except Exception:
        pass
    vmem_limit = min(max(vmem_cap - (16 << 20), 32 << 20), 100 << 20)
    tile_budget = vmem_limit - (8 << 20)

    in_dtype = mxu_dtype if mxu_dtype is not None else x1.dtype
    in_bytes = jnp.dtype(in_dtype).itemsize
    out_bytes = jnp.dtype(out_dtype).itemsize

    bn, bm, bk = _choose_tiles(n, m, f, in_bytes, out_bytes, tile_budget)

    gamma = jnp.float32(gamma)
    x1f = x1.astype(jnp.float32)
    x2f = x2.astype(jnp.float32)
    # gamma folded into the norms once (saves a per-tile VPU multiply in-kernel).
    sq1 = (-gamma) * jnp.sum(x1f * x1f, axis=-1, keepdims=True)        # (n, 1)
    sq2 = ((-gamma) * jnp.sum(x2f * x2f, axis=-1, keepdims=True)).T    # (1, m)

    # Pre-transpose x2 once: RHS tile already in MXU (K, N) layout, lane-dense
    # DMA along M, no per-grid-step XLU transpose.
    x1_in = x1.astype(in_dtype)
    x2t = x2.T.astype(in_dtype)                                        # (f, m)

    # Only pad the feature axis, and only when a K split is needed (zero
    # padding leaves the dot product unchanged). Ragged N / M tails are
    # handled by Pallas boundary blocks (clipped DMAs / masked stores), so no
    # big jnp.pad copies of x1/x2 and no output slice are needed.
    f_pad = _round_up(f, bk)
    if f_pad != f:
        x1_in = jnp.pad(x1_in, ((0, 0), (0, f_pad - f)))
        x2t = jnp.pad(x2t, ((0, f_pad - f), (0, 0)))

    scal = jnp.full((1,), 2.0 * gamma, dtype=jnp.float32)

    grid = (pl.cdiv(n, bn), pl.cdiv(m, bm), f_pad // bk)

    out = pl.pallas_call(
        _rbf_kernel_body,
        out_shape=jax.ShapeDtypeStruct((n, m), out_dtype),
        grid_spec=pltpu.PrefetchScalarGridSpec(
            num_scalar_prefetch=0,
            grid=grid,
            in_specs=[
                # 2*gamma: tiny scalar in SMEM (no retrace per gamma value).
                pl.BlockSpec(memory_space=pltpu.MemorySpace.SMEM),
                # precomputed (-gamma * squared norm) tiles.
                pl.BlockSpec((bn, 1), lambda i, j, k: (i, 0)),
                pl.BlockSpec((1, bm), lambda i, j, k: (0, j)),
                # x1 tiled along (N, K); x2^T tiled along (K, M).
                pl.BlockSpec((bn, bk), lambda i, j, k: (i, k)),
                pl.BlockSpec((bk, bm), lambda i, j, k: (k, j)),
            ],
            out_specs=pl.BlockSpec((bn, bm), lambda i, j, k: (i, j)),
            scratch_shapes=[pltpu.VMEM((bn, bm), jnp.float32)],
        ),
        compiler_params=pltpu.CompilerParams(
            dimension_semantics=("parallel", "parallel", "arbitrary"),
            vmem_limit_bytes=int(vmem_limit),
        ),
    )(scal, sq1, sq2, x1_in, x2t)

    return out


def rbf_kernel_matrix_ref(x1, x2, gamma):
    """Pure-JAX reference for correctness checking."""
    x1 = x1.astype(jnp.float32)
    x2 = x2.astype(jnp.float32)
    sq1 = jnp.sum(x1 * x1, axis=-1, keepdims=True)
    sq2 = jnp.sum(x2 * x2, axis=-1, keepdims=True).T
    dist = jnp.maximum(sq1 + sq2 - 2.0 * x1 @ x2.T, 0.0)
    return jnp.exp(-gamma * dist)


# TODO(synk): `forward` / `forward_dist` are abstract (NotImplementedError) in
# the PyTorch base class; only the RBF instantiation of kernel_matrix is
# implemented here.

if __name__ == "__main__":
    key = jax.random.PRNGKey(0)
    k1, k2 = jax.random.split(key)

    # Small shapes consistent with (n, f) x (m, f); M deliberately not a
    # multiple of 128 to exercise the ragged boundary-block path.
    N, M, F = 32, 48, 32
    gamma = 0.5

    x1 = jax.random.normal(k1, (N, F), dtype=jnp.float32)
    x2 = jax.random.normal(k2, (M, F), dtype=jnp.float32)

    out = rbf_kernel_matrix(x1, x2, gamma)
    out = jax.block_until_ready(out)

    ref = rbf_kernel_matrix_ref(x1, x2, gamma)
    assert out.shape == (N, M)
    assert jnp.allclose(out, ref, atol=1e-5, rtol=1e-5), "mismatch vs reference"

    print("KERNEL_OK")
</pallas_src>

<mosaic_0001>
module attributes {stable_mosaic.version = 11 : i64} {
  func.func @_rbf_kernel_body(%arg0: i32, %arg1: i32, %arg2: i32, %arg3: memref<1xf32, #tpu.memory_space<smem>>, %arg4: memref<32x1xf32, #tpu.memory_space<vmem>>, %arg5: memref<1x128xf32, #tpu.memory_space<vmem>>, %arg6: memref<32x32xf32, #tpu.memory_space<vmem>>, %arg7: memref<32x128xf32, #tpu.memory_space<vmem>>, %arg8: memref<32x128xf32, #tpu.memory_space<vmem>>, %arg9: memref<32x128xf32, #tpu.memory_space<vmem>>) attributes {dimension_semantics = [#tpu.dimension_semantics<parallel>, #tpu.dimension_semantics<parallel>, #tpu.dimension_semantics<arbitrary>], iteration_bounds = array<i64: 1, 1, 1>, scalar_prefetch = 0 : i64, scratch_operands = 1 : i64, tpu.core_type = #tpu.core_type<tc>, window_params = [{transform_indices = @transform_0, window_bounds = array<i64: 1>}, {transform_indices = @transform_1, window_bounds = array<i64: 32, 1>}, {transform_indices = @transform_2, window_bounds = array<i64: 1, 128>}, {transform_indices = @transform_3, window_bounds = array<i64: 32, 32>}, {transform_indices = @transform_4, window_bounds = array<i64: 32, 128>}, {transform_indices = @transform_5, window_bounds = array<i64: 32, 128>}]} {
    %c0_i32 = arith.constant 0 : i32
    %0 = arith.cmpi eq, %arg2, %c0_i32 : i32
    %1 = arith.extui %0 : i1 to i32
    %c0_i32_0 = arith.constant 0 : i32
    %2 = arith.cmpi ne, %1, %c0_i32_0 : i32
    scf.if %2 {
      %cst_10 = arith.constant 0.000000e+00 : f32
      %12 = vector.broadcast %cst_10 : f32 to vector<32x128xf32>
      %c0_11 = arith.constant 0 : index
      %c0_12 = arith.constant 0 : index
      %13 = vector.load %arg9[%c0_11, %c0_12] : memref<32x128xf32, #tpu.memory_space<vmem>>, vector<32x128xf32>
      tpu.vector_store %arg9[%c0_11, %c0_12], %12 {strides = array<i32>} : memref<32x128xf32, #tpu.memory_space<vmem>>, vector<32x128xf32>,
    } else {
    }
    %c0 = arith.constant 0 : index
    %c0_1 = arith.constant 0 : index
    %3 = vector.load %arg9[%c0, %c0_1] : memref<32x128xf32, #tpu.memory_space<vmem>>, vector<32x128xf32>
    %c0_2 = arith.constant 0 : index
    %c0_3 = arith.constant 0 : index
    %4 = vector.load %arg6[%c0_2, %c0_3] : memref<32x32xf32, #tpu.memory_space<vmem>>, vector<32x32xf32>
    %c0_4 = arith.constant 0 : index
    %c0_5 = arith.constant 0 : index
    %5 = vector.load %arg7[%c0_4, %c0_5] : memref<32x128xf32, #tpu.memory_space<vmem>>, vector<32x128xf32>
    %cst = arith.constant dense<0.000000e+00> : vector<32x128xf32>
    %6 = tpu.matmul %4, %5, %cst {dimension_numbers = #tpu.dot_dimension_numbers<[1], [0], [0], [1], [0, 0, 1, 1], [], []>} : vector<32x32xf32>, vector<32x128xf32>, vector<32x128xf32> -> vector<32x128xf32>
    %7 = arith.addf %3, %6 : vector<32x128xf32>
    %c0_6 = arith.constant 0 : index
    %c0_7 = arith.constant 0 : index
    %8 = vector.load %arg9[%c0_6, %c0_7] : memref<32x128xf32, #tpu.memory_space<vmem>>, vector<32x128xf32>
    tpu.vector_store %arg9[%c0_6, %c0_7], %7 {strides = array<i32>} : memref<32x128xf32, #tpu.memory_space<vmem>>, vector<32x128xf32>,
    %c0_i32_8 = arith.constant 0 : i32
    %9 = arith.cmpi eq, %arg2, %c0_i32_8 : i32
    %10 = arith.extui %9 : i1 to i32
    %c0_i32_9 = arith.constant 0 : i32
    %11 = arith.cmpi ne, %10, %c0_i32_9 : i32
    scf.if %11 {
      %c0_10 = arith.constant 0 : index
      %12 = memref.load %arg3[%c0_10] : memref<1xf32, #tpu.memory_space<smem>>
      %c0_11 = arith.constant 0 : index
      %c0_12 = arith.constant 0 : index
      %13 = vector.load %arg4[%c0_11, %c0_12] : memref<32x1xf32, #tpu.memory_space<vmem>>, vector<32x1xf32>
      %c0_13 = arith.constant 0 : index
      %c0_14 = arith.constant 0 : index
      %14 = vector.load %arg5[%c0_13, %c0_14] : memref<1x128xf32, #tpu.memory_space<vmem>>, vector<1x128xf32>
      %15 = vector.broadcast %13 : vector<32x1xf32> to vector<32x128xf32>
      %16 = vector.broadcast %14 : vector<1x128xf32> to vector<32x128xf32>
      %17 = arith.addf %15, %16 : vector<32x128xf32>
      %c0_15 = arith.constant 0 : index
      %c0_16 = arith.constant 0 : index
      %18 = vector.load %arg9[%c0_15, %c0_16] : memref<32x128xf32, #tpu.memory_space<vmem>>, vector<32x128xf32>
      %19 = vector.broadcast %12 : f32 to vector<32x128xf32>
      %20 = arith.mulf %19, %18 : vector<32x128xf32>
      %21 = arith.addf %17, %20 : vector<32x128xf32>
      %cst_17 = arith.constant 0.000000e+00 : f32
      %22 = vector.broadcast %cst_17 : f32 to vector<32x128xf32>
      %23 = arith.minimumf %21, %22 : vector<32x128xf32>
      %24 = math.exp %23 : vector<32x128xf32>
      %c0_18 = arith.constant 0 : index
      %c0_19 = arith.constant 0 : index
      %25 = vector.load %arg8[%c0_18, %c0_19] : memref<32x128xf32, #tpu.memory_space<vmem>>, vector<32x128xf32>
      tpu.vector_store %arg8[%c0_18, %c0_19], %24 {strides = array<i32>} : memref<32x128xf32, #tpu.memory_space<vmem>>, vector<32x128xf32>,
    } else {
    }
    return
  }
  func.func @transform_0(%arg0: i32, %arg1: i32, %arg2: i32) -> i32 {
    %c0_i32 = arith.constant 0 : i32
    %c0_i32_0 = arith.constant 0 : i32
    return %c0_i32 : i32
  }
  func.func @transform_1(%arg0: i32, %arg1: i32, %arg2: i32) -> (i32, i32) {
    %c0_i32 = arith.constant 0 : i32
    %c0_i32_0 = arith.constant 0 : i32
    return %arg0, %c0_i32 : i32, i32
  }
  func.func @transform_2(%arg0: i32, %arg1: i32, %arg2: i32) -> (i32, i32) {
    %c0_i32 = arith.constant 0 : i32
    %c0_i32_0 = arith.constant 0 : i32
    return %c0_i32, %arg1 : i32, i32
  }
  func.func @transform_3(%arg0: i32, %arg1: i32, %arg2: i32) -> (i32, i32) {
    %c0_i32 = arith.constant 0 : i32
    return %arg0, %arg2 : i32, i32
  }
  func.func @transform_4(%arg0: i32, %arg1: i32, %arg2: i32) -> (i32, i32) {
    %c0_i32 = arith.constant 0 : i32
    return %arg2, %arg1 : i32, i32
  }
  func.func @transform_5(%arg0: i32, %arg1: i32, %arg2: i32) -> (i32, i32) {
    %c0_i32 = arith.constant 0 : i32
    return %arg0, %arg1 : i32, i32
  }
}

</mosaic_0001>

<bundles_post_ra>
// kernel: tpu_custom_call.1
= control target key start
LH: loop header
LB: loop body
LE: loop exit
PB: predicated region body
PF: predicated region fallthrough
CT: control target
= control target key end

     0   :  { %11 = vsyncpa [#allocation5], 0  ;;  %s448_s0 = inlined_call_operand.<no memory space> [shape: f32[1], index: 0, kind: input, shape index: {}]   ;;  %s449_s1 = inlined_call_operand.vmem [shape: f32[32,1], index: 1, kind: input, shape index: {}]   ;;  %s450_s2 = inlined_call_operand.vmem [shape: f32[1,48], index: 2, kind: input, shape index: {}]   ;;  %s451_s3 = inlined_call_operand.vmem [shape: f32[32,32], index: 3, kind: input, shape index: {}]   ;;  %s452_s4 = inlined_call_operand.hbm [shape: f32[32,48], index: 4, kind: input, shape index: {}]   ;;  %s453_s5 = inlined_call_operand.hbm [shape: f32[32,48], index: 5, kind: output, shape index: {}]  }
   0x1   :  { %12 = vsyncpa [#allocation6], 0  ;;  %s349_s18 = smov [#allocation4]   ;;  %s301_s22 = scalar_lea.hbm %s452_s4, 512 }
   0x2   :  { %s26_s19 = sshll.u32 %s349_s18, 4  ;;  %p302_p0 = scmp.ne.s32.totalorder %s452_s4, %s301_s22  ;;  %s27_s19 = int_to_ptr.vmem [resolvable:$true] %s26_s19 }
   0x3   :  { %p305_p1 = scmp.lt.u32.totalorder %s301_s22, %s452_s4 }
   0x5   :  { %p307_p2 = pnand %p305_p1, %p302_p0 }
   0x7   :  { %310 = shalt.err (!%p307_p2)
}
   0x8   :  { %s311_s27 = scalar_lea.vmem %s27_s19, 512  ;;  %p316_p4 = scmp.lt.s32.totalorder %s27_s19, %s27_s19 }
   0x9   :  { %p312_p3 = scmp.ne.s32.totalorder %s27_s19, %s311_s27  ;;  %p317_p5 = scmp.lt.s32.totalorder %s311_s27, %s311_s27 }
   0xb   :  { %p318_p6 = por %p317_p5, %p316_p4 }
   0xd   :  { %p319_p7 = pnand %p318_p6, %p312_p3 }
   0xf   :  { %322 = shalt.err (!%p319_p7)
}
  0x10   :  { %s350_s28 = smov 128   ;;  %s351_s29 = smov 8  }
  0x11   :  { %32 = dma.hbm_to_vmem [thread:$0]  %s452_s4, 512, %s27_s19, [#allocation5], %s350_s28, %s350_s28, %s351_s29  }
  0x12   :  { %345 = dma.done.wait [#allocation5], 512  }
  0x13   :  { %346 = vsyncadd [#allocation5], 4294966784  ;;  %v352_v0 = vmov 0   ;;  %vm56_vm0 = vcmask 261120   ;;  %v52_v1 = vld [vmem:[#allocation4] sm:$0xff]  ;;  %v53_v2 = vld [vmem:[#allocation4 + $0x8] sm:$0xff]  ;;  %v205_v20 = vstv %s448_s0 }
  0x14   :  { %292 = vset.pattern.permute.xlu1 %v352_v0  ;;  %291 = vset.pattern.permute.xlu0 %v352_v0  ;;  %v54_v3 = vld [vmem:[#allocation4 + $0x10] sm:$0xff]  ;;  %v274_v4 = vpack.c.bf16 %v53_v2, %v52_v1  ;;  %v55_v5 = vld [vmem:[#allocation4 + $0x18] sm:$0xff]  ;;  %v48_v6 = vld [vmem:[%s451_s3] sm:$0xff]  ;;  %s353_s0 = smov [#allocation7]  }
  0x15   :  { %v50_v7 = vld [vmem:[%s451_s3 + $0x10] sm:$0xff]  ;;  %v278_v8 = vpack.c.bf16 %v55_v5, %v54_v3  ;;  %268 = vmatprep.mubr.msk.f32.mxu0 %vm56_vm0, %v48_v6  ;;  %v166_v10 = vld [vmem:[%s449_s1] sm:$0xff]  ;;  %v169_v11 = vld [vmem:[%s449_s1 + $0x18] sm:$0xff] }
  0x16   :  { %271 = vmatprep.mubr.msk.f32.mxu1 %vm56_vm0, %v50_v7  ;;  %275 = vmatprep.subr.bf16.mxu0 %v274_v4  ;;  %v168_v9 = vld [vmem:[%s449_s1 + $0x10] sm:$0xff]  ;;  %v167_v12 = vld [vmem:[%s449_s1 + $0x8] sm:$0xff]  ;;  %v51_v14 = vld [vmem:[%s451_s3 + $0x18] sm:$0xff] }
  0x17   :  { %282 = vmatprep.subr.bf16.mxu1 %v274_v4  ;;  %277 = vmatpush3.bf16.msra.mxu0 %v274_v4  ;;  %v49_v13 = vld [vmem:[%s451_s3 + $0x8] sm:$0xff]  ;;  %v251_v17 = vld [vmem:[%s450_s2] ss:$0 sm:$0xff]  ;;  %s235_s2 = sshll.u32 %s353_s0, 4  ;;  %s236_s2 = int_to_ptr.vmem [resolvable:$true] %s235_s2 }
  0x18   :  { %284 = vmatpush3.bf16.msra.mxu1 %v274_v4  ;;  %279 = vmatprep.subr.bf16.mxu0 %v278_v8  ;;  %s323_s3 = scalar_lea.vmem %s236_s2, 512  ;;  %p328_p9 = scmp.lt.s32.totalorder %s236_s2, %s236_s2 }
  0x19   :  { %283 = vmatprep.subr.bf16.mxu1 %v278_v8  ;;  %183 = vperm.xlu1 %292, %v168_v9   ;;  %p324_p8 = scmp.ne.s32.totalorder %s236_s2, %s323_s3  ;;  %p329_p10 = scmp.lt.s32.totalorder %s323_s3, %s323_s3 }
  0x1a   :  { %173 = vperm.xlu0 %291, %v166_v10  }
  0x1b   :  { %281 = vmatpush3.bf16.msra.mxu0 %v278_v8  ;;  %p330_p11 = por %p329_p10, %p328_p9 }
  0x1c   :  { %285 = vmatpush3.bf16.msra.mxu1 %v278_v8 }
  0x1d   :  { %188 = vperm.xlu1 %292, %v169_v11   ;;  %p331_p12 = pnand %p330_p11, %p324_p8 }
  0x1e   :  { %178 = vperm.xlu0 %291, %v167_v12   ;;  %269 = vmatmul.mubr.msk.f32.vlgmr.msra.gmra.mrb[0].mxu0 %vm56_vm0, %v49_v13 }
  0x1f   :  { %272 = vmatmul.mubr.msk.f32.vlgmr.msra.gmra.mrb[0].mxu1 %vm56_vm0, %v51_v14 }
  0x98   :  { %v184_v15 = vpop.permute.xlu1 %183 }
  0x99   :  { %v174_v16 = vpop.permute.xlu0 %173  ;;  %v199_v29 = vadd.f32 %v251_v17, %v184_v15 }
  0x9a   :  { %v197_v30 = vadd.f32 %v251_v17, %v174_v16 }
  0x9c   :  { %v189_v18 = vpop.permute.xlu1 %188 }
  0x9d   :  { %v179_v19 = vpop.permute.xlu0 %178  ;;  %v200_v23 = vadd.f32 %v251_v17, %v189_v18 }
  0x9e   :  { %v198_v24 = vadd.f32 %v251_v17, %v179_v19 }
  0xf1   :  { %v270_v21 = vpop.f32.mrb[0].mxu0 }
  0xf2   :  { %v273_v22 = vpop.f32.mrb[0].mxu1  ;;  %v207_v25 = vmul.f32 %v270_v21, %v205_v20  ;;  %v135_v27 = vpop.f32.mrb[1].mxu0 }
  0xf3   :  { %v209_v26 = vmul.f32 %v273_v22, %v205_v20  ;;  %v145_v28 = vpop.f32.mrb[1].mxu1  ;;  %v206_v31 = vmul.f32 %v205_v20, %v135_v27 }
  0xf4   :  { %v208_v32 = vmul.f32 %v205_v20, %v145_v28  ;;  %v211_v33 = vadd.f32 %v207_v25, %v198_v24 }
  0xf5   :  { %v213_v34 = vadd.f32 %v209_v26, %v200_v23  ;;  %v210_v35 = vadd.f32 %v206_v31, %v197_v30 }
  0xf6   :  { %v212_v36 = vadd.f32 %v208_v32, %v199_v29  ;;  %v215_v37 = vmin.f32 %v211_v33, 0.0 }
  0xf7   :  { %v217_v38 = vmin.f32 %v213_v34, 0.0  ;;  %v214_v39 = vmin.f32 %v210_v35, 0.0 }
  0xf8   :  { %v216_v40 = vmin.f32 %v212_v36, 0.0  ;;  %v220_v41 = vmul.f32 1.442695, %v215_v37 }
  0xf9   :  { %v224_v42 = vmul.f32 1.442695, %v217_v38  ;;  %v218_v43 = vmul.f32 1.442695, %v214_v39 }
  0xfa   :  { %v222_v44 = vmul.f32 1.442695, %v216_v40  ;;  %293 = vpow2.f32 %v220_v41 }
  0xfb   :  { %295 = vpow2.f32 %v224_v42 }
  0xfc   :  { %297 = vpow2.f32 %v218_v43 }
  0xfd   :  { %299 = vpow2.f32 %v222_v44 }
 0x104   :  { %v294_v45 = vpop.eup %293 }
 0x105   :  { %v296_v46 = vpop.eup %295  ;;  %227 = vst [vmem:[#allocation7 + $0x8] sm:$0xff] %v294_v45 }
 0x106   :  { %v298_v47 = vpop.eup %297  ;;  %229 = vst [vmem:[#allocation7 + $0x18] sm:$0xff] %v296_v46 }
 0x107   :  { %v300_v48 = vpop.eup %299  ;;  %226 = vst [vmem:[#allocation7] sm:$0xff] %v298_v47 }
 0x108   :  { %228 = vst [vmem:[#allocation7 + $0x10] sm:$0xff] %v300_v48 }
 0x109   :  { %334 = shalt.err (!%p331_p12)
}
 0x10a   :  { %s335_s27 = scalar_lea.hbm %s453_s5, 512 }
 0x10b   :  { %p336_p13 = scmp.ne.s32.totalorder %s453_s5, %s335_s27  ;;  %p339_p0 = scmp.lt.u32.totalorder %s335_s27, %s453_s5 }
 0x10d   :  { %p341_p1 = pnand %p339_p0, %p336_p13 }
 0x10f   :  { %344 = shalt.err (!%p341_p1)
}
 0x110   :  { %241 = dma.vmem_to_hbm [thread:$0]  %s236_s2, 512, %s453_s5, [#allocation6], %s350_s28, %s350_s28, %s351_s29  }
 0x111   :  { %347 = dma.done.wait [#allocation6], 512  }
 0x112   :  { %348 = vsyncadd [#allocation6], 4294966784 }
 0x113   :  { %245 = vsyncpa [#allocation5], 1 }
 0x114   :  { %246 = vsyncpa [#allocation6], 1 }

</bundles_post_ra>
